<compile_context>
chip_gen: v6e
topology: v6e:2x2x1
jax: 0.10.0
libtpu: 0.0.40
codegen_flags: <defaults>
</compile_context>

<pallas_src>
import functools

import numpy as np
import jax
import jax.numpy as jnp
from jax.experimental import pallas as pl
from jax.experimental.pallas import tpu as pltpu


# ------------------------------ fused Pallas kernel ---------------------------

def _rev_block_kernel(x1_ref, x2_ref, ac_ref, av_ref, m_ref, wcg_ref,
                      biasf_ref, w1g_ref, wt_ref, selt_ref, vec_ref,
                      y1_ref, y2_ref, *, n_sub, eps_c, eps_v):
    """One batch element of SimpleReversibleBlock, everything stays in VMEM.

    Per grid step (batch squeezed):
      x1   : (N_v, dim_v) f32
      x2   : (N_c, dim_c) f32             token layout, also the Y2 residual
      ac   : (dim_c, dim_c) f32           1/dim_c averaging matrix (LN_c stats)
      av   : (dim_v, dim_v) f32           1/dim_v averaging matrix (LN_v stats)
      m    : (n_sub, N_v, N_c) bf16       token_mixer @ Sel_s  (mixer + gather)
      wcg  : (n_sub, dim_c, dim_v) bf16   diag(gamma_c) @ conv_w[:, :, i, j].T
      biasf: (N_v, dim_v) f32             tm_b + rowsum(tm_w)*(conv_b + beta_c@sum_s Wc_s)
      w1g  : (dim_v, dim_c) bf16          diag(ln_v_w) @ fc1_w.T
      wt   : (n_sub, dim_c, dim_c) bf16   convT_w[:, :, i, j]
      selt : (n_sub, N_c, N_v) bf16       Sel_s.T  (patch -> token scatter)
      vec  : (2, dim_c) f32               row 0: fc1 bias (ln_v_b folded),
                                          row 1: convT bias
    """
    f32 = jnp.float32
    bf16 = jnp.bfloat16

    # ----------------- F = TokenMixerFBlockC2V,  Y1 = X1 + F(X2) --------------
    x2 = x2_ref[...]
    ac = ac_ref[...]
    mu = jnp.dot(x2, ac, preferred_element_type=f32)          # per-token mean (MXU)
    xc = x2 - mu
    var = jnp.dot(xc * xc, ac, preferred_element_type=f32)    # per-token var (MXU)
    xhat = (xc * jax.lax.rsqrt(var + eps_c)).astype(bf16)     # LN affine folded away

    y1 = x1_ref[...] + biasf_ref[...]
    for s in range(n_sub):                 # static unroll over pool*pool taps
        u = jnp.dot(m_ref[s], xhat, preferred_element_type=f32)            # (N_v, dim_c)
        y1 = y1 + jnp.dot(u.astype(bf16), wcg_ref[s], preferred_element_type=f32)
    y1_ref[...] = y1

    # ----------------- G = MLPSubblockV2C,       Y2 = X2 + G(Y1) --------------
    av = av_ref[...]
    mu_v = jnp.dot(y1, av, preferred_element_type=f32)
    yc = y1 - mu_v
    var_v = jnp.dot(yc * yc, av, preferred_element_type=f32)
    yhat = (yc * jax.lax.rsqrt(var_v + eps_v)).astype(bf16)

    fc1_b = vec_ref[0:1, :]
    convT_b = vec_ref[1:2, :]
    h = jnp.dot(yhat, w1g_ref[...], preferred_element_type=f32) + fc1_b     # (N_v, dim_c)
    # tanh-form GELU (EUP); |err| vs exact erf GELU < 3e-3, within tolerance
    h = 0.5 * h * (1.0 + jnp.tanh(0.7978845608028654 * (h + 0.044715 * h * h * h)))
    h = h.astype(bf16)

    y2 = x2 + convT_b                                          # convT bias broadcast
    for s in range(n_sub):
        g = jnp.dot(h, wt_ref[s], preferred_element_type=f32)               # (N_v, dim_c)
        y2 = y2 + jnp.dot(selt_ref[s], g.astype(bf16), preferred_element_type=f32)
    y2_ref[...] = y2


# ------------------------- one-time parameter preparation ---------------------

def prepare_params(params, *, dim_c, dim_v, patches_shape, pool):
    """Hoists every reshape / transpose / LN-affine fold out of the forward."""
    H, W = patches_shape
    Hv, Wv = H // pool, W // pool
    N_v, N_c = Hv * Wv, H * W
    n_sub = pool * pool
    f32, bf16 = jnp.float32, jnp.bfloat16

    tm_w = np.asarray(params["tm_w"], np.float32)          # (N_v, N_v)
    tm_b = np.asarray(params["tm_b"], np.float32)          # (N_v,)
    conv_w = np.asarray(params["conv_w"], np.float32)      # (dim_v, dim_c, p, p)
    conv_b = np.asarray(params["conv_b"], np.float32)      # (dim_v,)
    gamma_c = np.asarray(params["ln_c_w"], np.float32)
    beta_c = np.asarray(params["ln_c_b"], np.float32)
    ln_v_w = np.asarray(params["ln_v_w"], np.float32)
    ln_v_b = np.asarray(params["ln_v_b"], np.float32)
    fc1_w = np.asarray(params["fc1_w"], np.float32)        # (dim_c, dim_v)
    fc1_b = np.asarray(params["fc1_b"], np.float32)        # (dim_c,)
    convT_w = np.asarray(params["convT_w"], np.float32)    # (dim_c, dim_c, p, p)
    convT_b = np.asarray(params["convT_b"], np.float32)    # (dim_c,)

    # selection matrices: Sel_s[v, n] = 1 iff token n is sub-position s of patch v
    sel = np.zeros((n_sub, N_v, N_c), np.float32)
    for hv in range(Hv):
        for wv in range(Wv):
            v = hv * Wv + wv
            for i in range(pool):
                for j in range(pool):
                    s = i * pool + j
                    n = (hv * pool + i) * W + (wv * pool + j)
                    sel[s, v, n] = 1.0

    # token mixer folded into the gather:  M_s = tm_w @ Sel_s
    m = np.einsum("mv,svn->smn", tm_w, sel)                # (n_sub, N_v, N_c)
    selt = np.transpose(sel, (0, 2, 1))                    # (n_sub, N_c, N_v)

    # Conv2d weight per sub-position, gamma_c folded in
    wc = np.transpose(conv_w, (2, 3, 1, 0)).reshape(n_sub, dim_c, dim_v)
    wcg = gamma_c[None, :, None] * wc
    # beta_c / conv bias / token-mixer bias folded into one (N_v, dim_v) bias
    cvec = conv_b + beta_c @ wc.sum(axis=0)                # (dim_v,)
    bias_f = tm_w.sum(axis=1)[:, None] * cvec[None, :] + tm_b[:, None]

    # LayerNorm(dim_v) affine folded into fc1
    w1g = (fc1_w * ln_v_w[None, :]).T                      # (dim_v, dim_c)
    fc1_b_fold = fc1_b + ln_v_b @ fc1_w.T                  # (dim_c,)

    # ConvTranspose2d weight per sub-position
    wt = np.transpose(convT_w, (2, 3, 0, 1)).reshape(n_sub, dim_c, dim_c)

    # per-token LN statistics as tiny averaging matmuls (MXU)
    ac = np.full((dim_c, dim_c), 1.0 / dim_c, np.float32)
    av = np.full((dim_v, dim_v), 1.0 / dim_v, np.float32)

    vec = np.stack([fc1_b_fold, convT_b])                  # (2, dim_c)

    return dict(
        ac=jnp.asarray(ac, f32), av=jnp.asarray(av, f32),
        m=jnp.asarray(m, bf16), wcg=jnp.asarray(wcg, bf16),
        bias_f=jnp.asarray(bias_f, f32),
        w1g=jnp.asarray(w1g, bf16), wt=jnp.asarray(wt, bf16),
        selt=jnp.asarray(selt, bf16), vec=jnp.asarray(vec, f32),
    )


# --------------------------- fused block forward (Pallas) ---------------------

def fused_block_forward(X1, X2, kp, *, pool):
    B, N_v, dim_v = X1.shape
    _, N_c, dim_c = X2.shape
    n_sub = pool * pool

    kernel = functools.partial(_rev_block_kernel, n_sub=n_sub,
                               eps_c=1e-6, eps_v=1e-5)

    batch3 = lambda b: (b, 0, 0)   # per-batch activation blocks
    rep2 = lambda b: (0, 0)        # batch-invariant weights (fetched once)
    rep3 = lambda b: (0, 0, 0)

    y1, y2 = pl.pallas_call(
        kernel,
        out_shape=(jax.ShapeDtypeStruct((B, N_v, dim_v), jnp.float32),
                   jax.ShapeDtypeStruct((B, N_c, dim_c), jnp.float32)),
        grid=(B,),
        in_specs=[
            pl.BlockSpec((None, N_v, dim_v), batch3),        # X1
            pl.BlockSpec((None, N_c, dim_c), batch3),        # X2
            pl.BlockSpec((dim_c, dim_c), rep2),              # ac
            pl.BlockSpec((dim_v, dim_v), rep2),              # av
            pl.BlockSpec((n_sub, N_v, N_c), rep3),           # m
            pl.BlockSpec((n_sub, dim_c, dim_v), rep3),       # wcg
            pl.BlockSpec((N_v, dim_v), rep2),                # bias_f
            pl.BlockSpec((dim_v, dim_c), rep2),              # w1g
            pl.BlockSpec((n_sub, dim_c, dim_c), rep3),       # wt
            pl.BlockSpec((n_sub, N_c, N_v), rep3),           # selt
            pl.BlockSpec((2, dim_c), rep2),                  # vec (packed biases)
        ],
        out_specs=(pl.BlockSpec((None, N_v, dim_v), batch3),
                   pl.BlockSpec((None, N_c, dim_c), batch3)),
        input_output_aliases={0: 0, 1: 1},                   # X1 -> Y1, X2 -> Y2
        compiler_params=pltpu.CompilerParams(
            dimension_semantics=("parallel",),
            vmem_limit_bytes=32 * 1024 * 1024),
    )(X1, X2, kp["ac"], kp["av"], kp["m"], kp["wcg"], kp["bias_f"],
      kp["w1g"], kp["wt"], kp["selt"], kp["vec"])
    return y1, y2


# ------------------------------ pure-JAX reference ----------------------------

def reference_forward(X1, X2, params, *, dim_c, dim_v, patches_shape, pool):
    B, N_c, _ = X2.shape
    H, W = patches_shape
    Hv, Wv = H // pool, W // pool
    N_v = Hv * Wv
    hp = jax.lax.Precision.HIGHEST

    # F = TokenMixerFBlockC2V
    x = X2
    mean = x.mean(-1, keepdims=True)
    var = ((x - mean) ** 2).mean(-1, keepdims=True)
    xn = (x - mean) / jnp.sqrt(var + 1e-6) * params["ln_c_w"] + params["ln_c_b"]
    x_img = xn.transpose(0, 2, 1).reshape(B, dim_c, H, W)
    xp = x_img.reshape(B, dim_c, Hv, pool, Wv, pool)
    conv = jnp.einsum("vcij,bchiwj->bvhw", params["conv_w"], xp, precision=hp)
    conv = conv + params["conv_b"][None, :, None, None]
    conv = conv.reshape(B, dim_v, N_v)
    tm = jnp.einsum("mn,bvn->bvm", params["tm_w"], conv, precision=hp) + params["tm_b"]
    Y1 = X1 + tm.transpose(0, 2, 1)

    # G = MLPSubblockV2C
    y = Y1
    mean = y.mean(-1, keepdims=True)
    var = ((y - mean) ** 2).mean(-1, keepdims=True)
    yn = (y - mean) / jnp.sqrt(var + 1e-5) * params["ln_v_w"] + params["ln_v_b"]
    h = jnp.einsum("bnd,cd->bnc", yn, params["fc1_w"], precision=hp) + params["fc1_b"]
    h = jax.nn.gelu(h, approximate=False)
    h_img = h.transpose(0, 2, 1).reshape(B, dim_c, Hv, Wv)
    gt = jnp.einsum("dcij,bdhw->bchiwj", params["convT_w"], h_img, precision=hp)
    gt = gt + params["convT_b"][None, :, None, None, None, None]
    g_out = gt.reshape(B, dim_c, N_c).transpose(0, 2, 1)
    Y2 = X2 + g_out
    return Y1, Y2


# ------------------------------ parameter init --------------------------------

def init_params(key, dim_c, dim_v, patches_shape, pool):
    Hv, Wv = patches_shape[0] // pool, patches_shape[1] // pool
    N_v = Hv * Wv
    ks = jax.random.split(key, 12)
    f32 = jnp.float32
    return dict(
        # TokenMixerFBlockC2V
        ln_c_w=1.0 + 0.05 * jax.random.normal(ks[0], (dim_c,), f32),
        ln_c_b=0.05 * jax.random.normal(ks[1], (dim_c,), f32),
        conv_w=0.1 * jax.random.normal(ks[2], (dim_v, dim_c, pool, pool), f32),
        conv_b=0.1 * jax.random.normal(ks[3], (dim_v,), f32),
        tm_w=0.1 * jax.random.normal(ks[4], (N_v, N_v), f32),
        tm_b=0.1 * jax.random.normal(ks[5], (N_v,), f32),
        # MLPSubblockV2C
        ln_v_w=1.0 + 0.05 * jax.random.normal(ks[6], (dim_v,), f32),
        ln_v_b=0.05 * jax.random.normal(ks[7], (dim_v,), f32),
        fc1_w=0.1 * jax.random.normal(ks[8], (dim_c, dim_v), f32),
        fc1_b=0.1 * jax.random.normal(ks[9], (dim_c,), f32),
        convT_w=0.1 * jax.random.normal(ks[10], (dim_c, dim_c, pool, pool), f32),
        convT_b=0.1 * jax.random.normal(ks[11], (dim_c,), f32),
    )


# ------------------------------------ main -------------------------------------

if __name__ == "__main__":
    B = 2
    dim_c, dim_v = 8, 16
    pool = 2
    patches_shape = (8, 8)
    H, W = patches_shape
    N_c = H * W                          # 64 "c-stream" tokens
    N_v = (H // pool) * (W // pool)      # 16 "v-stream" tokens

    key = jax.random.PRNGKey(0)
    k_params, k_x1, k_x2 = jax.random.split(key, 3)
    params = init_params(k_params, dim_c, dim_v, patches_shape, pool)
    X1 = jax.random.normal(k_x1, (B, N_v, dim_v), jnp.float32)
    X2 = jax.random.normal(k_x2, (B, N_c, dim_c), jnp.float32)

    # one-time parameter preparation (reshapes / LN folds / selection matrices)
    kparams = prepare_params(params, dim_c=dim_c, dim_v=dim_v,
                             patches_shape=patches_shape, pool=pool)

    fwd = jax.jit(functools.partial(fused_block_forward, pool=pool))
    Y1, Y2 = fwd(X1, X2, kparams)
    jax.block_until_ready((Y1, Y2))

    Y1_ref, Y2_ref = reference_forward(X1, X2, params, dim_c=dim_c, dim_v=dim_v,
                                       patches_shape=patches_shape, pool=pool)
    np.testing.assert_allclose(np.asarray(Y1), np.asarray(Y1_ref), rtol=1e-2, atol=1e-2)
    np.testing.assert_allclose(np.asarray(Y2), np.asarray(Y2_ref), rtol=1e-2, atol=1e-2)

    print("KERNEL_OK")
</pallas_src>

<mosaic_0001>
module attributes {stable_mosaic.version = 11 : i64} {
  func.func @_rev_block_kernel(%arg0: i32, %arg1: memref<1x16x16xf32, #tpu.memory_space<vmem>>, %arg2: memref<1x64x8xf32, #tpu.memory_space<vmem>>, %arg3: memref<8x8xf32, #tpu.memory_space<vmem>>, %arg4: memref<16x16xf32, #tpu.memory_space<vmem>>, %arg5: memref<4x16x64xbf16, #tpu.memory_space<vmem>>, %arg6: memref<4x8x16xbf16, #tpu.memory_space<vmem>>, %arg7: memref<16x16xf32, #tpu.memory_space<vmem>>, %arg8: memref<16x8xbf16, #tpu.memory_space<vmem>>, %arg9: memref<4x8x8xbf16, #tpu.memory_space<vmem>>, %arg10: memref<4x64x16xbf16, #tpu.memory_space<vmem>>, %arg11: memref<2x8xf32, #tpu.memory_space<vmem>>, %arg12: memref<1x16x16xf32, #tpu.memory_space<vmem>>, %arg13: memref<1x64x8xf32, #tpu.memory_space<vmem>>) attributes {dimension_semantics = [#tpu.dimension_semantics<parallel>], iteration_bounds = array<i64: 2>, scalar_prefetch = 0 : i64, scratch_operands = 0 : i64, tpu.core_type = #tpu.core_type<tc>, window_params = [{transform_indices = @transform_0, window_bounds = array<i64: 1, 16, 16>}, {transform_indices = @transform_1, window_bounds = array<i64: 1, 64, 8>}, {pipeline_mode = #tpu.pipeline_mode<synchronous>, transform_indices = @transform_2, window_bounds = array<i64: 8, 8>}, {pipeline_mode = #tpu.pipeline_mode<synchronous>, transform_indices = @transform_3, window_bounds = array<i64: 16, 16>}, {pipeline_mode = #tpu.pipeline_mode<synchronous>, transform_indices = @transform_4, window_bounds = array<i64: 4, 16, 64>}, {pipeline_mode = #tpu.pipeline_mode<synchronous>, transform_indices = @transform_5, window_bounds = array<i64: 4, 8, 16>}, {pipeline_mode = #tpu.pipeline_mode<synchronous>, transform_indices = @transform_6, window_bounds = array<i64: 16, 16>}, {pipeline_mode = #tpu.pipeline_mode<synchronous>, transform_indices = @transform_7, window_bounds = array<i64: 16, 8>}, {pipeline_mode = #tpu.pipeline_mode<synchronous>, transform_indices = @transform_8, window_bounds = array<i64: 4, 8, 8>}, {pipeline_mode = #tpu.pipeline_mode<synchronous>, transform_indices = @transform_9, window_bounds = array<i64: 4, 64, 16>}, {pipeline_mode = #tpu.pipeline_mode<synchronous>, transform_indices = @transform_10, window_bounds = array<i64: 2, 8>}, {transform_indices = @transform_11, window_bounds = array<i64: 1, 16, 16>}, {transform_indices = @transform_12, window_bounds = array<i64: 1, 64, 8>}]} {
    %c0 = arith.constant 0 : index
    %c0_0 = arith.constant 0 : index
    %c0_1 = arith.constant 0 : index
    %0 = vector.load %arg2[%c0, %c0_0, %c0_1] : memref<1x64x8xf32, #tpu.memory_space<vmem>>, vector<1x64x8xf32>
    %1 = vector.shape_cast %0 : vector<1x64x8xf32> to vector<64x8xf32>
    %c0_2 = arith.constant 0 : index
    %c0_3 = arith.constant 0 : index
    %2 = vector.load %arg3[%c0_2, %c0_3] : memref<8x8xf32, #tpu.memory_space<vmem>>, vector<8x8xf32>
    %cst = arith.constant dense<0.000000e+00> : vector<64x8xf32>
    %3 = tpu.matmul %1, %2, %cst {dimension_numbers = #tpu.dot_dimension_numbers<[1], [0], [0], [1], [0, 0, 1, 1], [], []>} : vector<64x8xf32>, vector<8x8xf32>, vector<64x8xf32> -> vector<64x8xf32>
    %4 = arith.subf %1, %3 : vector<64x8xf32>
    %5 = arith.mulf %4, %4 : vector<64x8xf32>
    %cst_4 = arith.constant dense<0.000000e+00> : vector<64x8xf32>
    %6 = tpu.matmul %5, %2, %cst_4 {dimension_numbers = #tpu.dot_dimension_numbers<[1], [0], [0], [1], [0, 0, 1, 1], [], []>} : vector<64x8xf32>, vector<8x8xf32>, vector<64x8xf32> -> vector<64x8xf32>
    %cst_5 = arith.constant 9.99999997E-7 : f32
    %7 = vector.broadcast %cst_5 : f32 to vector<64x8xf32>
    %8 = arith.addf %6, %7 : vector<64x8xf32>
    %9 = math.rsqrt %8 : vector<64x8xf32>
    %10 = arith.mulf %4, %9 : vector<64x8xf32>
    %11 = arith.truncf %10 : vector<64x8xf32> to vector<64x8xbf16>
    %c0_6 = arith.constant 0 : index
    %c0_7 = arith.constant 0 : index
    %c0_8 = arith.constant 0 : index
    %12 = vector.load %arg1[%c0_6, %c0_7, %c0_8] : memref<1x16x16xf32, #tpu.memory_space<vmem>>, vector<1x16x16xf32>
    %13 = vector.shape_cast %12 : vector<1x16x16xf32> to vector<16x16xf32>
    %c0_9 = arith.constant 0 : index
    %c0_10 = arith.constant 0 : index
    %14 = vector.load %arg7[%c0_9, %c0_10] : memref<16x16xf32, #tpu.memory_space<vmem>>, vector<16x16xf32>
    %15 = arith.addf %13, %14 : vector<16x16xf32>
    %c0_11 = arith.constant 0 : index
    %c0_12 = arith.constant 0 : index
    %c0_13 = arith.constant 0 : index
    %16 = vector.load %arg5[%c0_11, %c0_12, %c0_13] : memref<4x16x64xbf16, #tpu.memory_space<vmem>>, vector<1x16x64xbf16>
    %17 = vector.shape_cast %16 : vector<1x16x64xbf16> to vector<16x64xbf16>
    %cst_14 = arith.constant dense<0.000000e+00> : vector<16x8xf32>
    %18 = tpu.matmul %17, %11, %cst_14 {dimension_numbers = #tpu.dot_dimension_numbers<[1], [0], [0], [1], [0, 0, 1, 1], [], []>} : vector<16x64xbf16>, vector<64x8xbf16>, vector<16x8xf32> -> vector<16x8xf32>
    %19 = arith.truncf %18 : vector<16x8xf32> to vector<16x8xbf16>
    %c0_15 = arith.constant 0 : index
    %c0_16 = arith.constant 0 : index
    %c0_17 = arith.constant 0 : index
    %20 = vector.load %arg6[%c0_15, %c0_16, %c0_17] : memref<4x8x16xbf16, #tpu.memory_space<vmem>>, vector<1x8x16xbf16>
    %21 = vector.shape_cast %20 : vector<1x8x16xbf16> to vector<8x16xbf16>
    %cst_18 = arith.constant dense<0.000000e+00> : vector<16x16xf32>
    %22 = tpu.matmul %19, %21, %cst_18 {dimension_numbers = #tpu.dot_dimension_numbers<[1], [0], [0], [1], [0, 0, 1, 1], [], []>} : vector<16x8xbf16>, vector<8x16xbf16>, vector<16x16xf32> -> vector<16x16xf32>
    %23 = arith.addf %15, %22 : vector<16x16xf32>
    %c1 = arith.constant 1 : index
    %c0_19 = arith.constant 0 : index
    %c0_20 = arith.constant 0 : index
    %24 = vector.load %arg5[%c1, %c0_19, %c0_20] : memref<4x16x64xbf16, #tpu.memory_space<vmem>>, vector<1x16x64xbf16>
    %25 = vector.shape_cast %24 : vector<1x16x64xbf16> to vector<16x64xbf16>
    %cst_21 = arith.constant dense<0.000000e+00> : vector<16x8xf32>
    %26 = tpu.matmul %25, %11, %cst_21 {dimension_numbers = #tpu.dot_dimension_numbers<[1], [0], [0], [1], [0, 0, 1, 1], [], []>} : vector<16x64xbf16>, vector<64x8xbf16>, vector<16x8xf32> -> vector<16x8xf32>
    %27 = arith.truncf %26 : vector<16x8xf32> to vector<16x8xbf16>
    %c1_22 = arith.constant 1 : index
    %c0_23 = arith.constant 0 : index
    %c0_24 = arith.constant 0 : index
    %28 = vector.load %arg6[%c1_22, %c0_23, %c0_24] : memref<4x8x16xbf16, #tpu.memory_space<vmem>>, vector<1x8x16xbf16>
    %29 = vector.shape_cast %28 : vector<1x8x16xbf16> to vector<8x16xbf16>
    %cst_25 = arith.constant dense<0.000000e+00> : vector<16x16xf32>
    %30 = tpu.matmul %27, %29, %cst_25 {dimension_numbers = #tpu.dot_dimension_numbers<[1], [0], [0], [1], [0, 0, 1, 1], [], []>} : vector<16x8xbf16>, vector<8x16xbf16>, vector<16x16xf32> -> vector<16x16xf32>
    %31 = arith.addf %23, %30 : vector<16x16xf32>
    %c2 = arith.constant 2 : index
    %c0_26 = arith.constant 0 : index
    %c0_27 = arith.constant 0 : index
    %32 = vector.load %arg5[%c2, %c0_26, %c0_27] : memref<4x16x64xbf16, #tpu.memory_space<vmem>>, vector<1x16x64xbf16>
    %33 = vector.shape_cast %32 : vector<1x16x64xbf16> to vector<16x64xbf16>
    %cst_28 = arith.constant dense<0.000000e+00> : vector<16x8xf32>
    %34 = tpu.matmul %33, %11, %cst_28 {dimension_numbers = #tpu.dot_dimension_numbers<[1], [0], [0], [1], [0, 0, 1, 1], [], []>} : vector<16x64xbf16>, vector<64x8xbf16>, vector<16x8xf32> -> vector<16x8xf32>
    %35 = arith.truncf %34 : vector<16x8xf32> to vector<16x8xbf16>
    %c2_29 = arith.constant 2 : index
    %c0_30 = arith.constant 0 : index
    %c0_31 = arith.constant 0 : index
    %36 = vector.load %arg6[%c2_29, %c0_30, %c0_31] : memref<4x8x16xbf16, #tpu.memory_space<vmem>>, vector<1x8x16xbf16>
    %37 = vector.shape_cast %36 : vector<1x8x16xbf16> to vector<8x16xbf16>
    %cst_32 = arith.constant dense<0.000000e+00> : vector<16x16xf32>
    %38 = tpu.matmul %35, %37, %cst_32 {dimension_numbers = #tpu.dot_dimension_numbers<[1], [0], [0], [1], [0, 0, 1, 1], [], []>} : vector<16x8xbf16>, vector<8x16xbf16>, vector<16x16xf32> -> vector<16x16xf32>
    %39 = arith.addf %31, %38 : vector<16x16xf32>
    %c3 = arith.constant 3 : index
    %c0_33 = arith.constant 0 : index
    %c0_34 = arith.constant 0 : index
    %40 = vector.load %arg5[%c3, %c0_33, %c0_34] : memref<4x16x64xbf16, #tpu.memory_space<vmem>>, vector<1x16x64xbf16>
    %41 = vector.shape_cast %40 : vector<1x16x64xbf16> to vector<16x64xbf16>
    %cst_35 = arith.constant dense<0.000000e+00> : vector<16x8xf32>
    %42 = tpu.matmul %41, %11, %cst_35 {dimension_numbers = #tpu.dot_dimension_numbers<[1], [0], [0], [1], [0, 0, 1, 1], [], []>} : vector<16x64xbf16>, vector<64x8xbf16>, vector<16x8xf32> -> vector<16x8xf32>
    %43 = arith.truncf %42 : vector<16x8xf32> to vector<16x8xbf16>
    %c3_36 = arith.constant 3 : index
    %c0_37 = arith.constant 0 : index
    %c0_38 = arith.constant 0 : index
    %44 = vector.load %arg6[%c3_36, %c0_37, %c0_38] : memref<4x8x16xbf16, #tpu.memory_space<vmem>>, vector<1x8x16xbf16>
    %45 = vector.shape_cast %44 : vector<1x8x16xbf16> to vector<8x16xbf16>
    %cst_39 = arith.constant dense<0.000000e+00> : vector<16x16xf32>
    %46 = tpu.matmul %43, %45, %cst_39 {dimension_numbers = #tpu.dot_dimension_numbers<[1], [0], [0], [1], [0, 0, 1, 1], [], []>} : vector<16x8xbf16>, vector<8x16xbf16>, vector<16x16xf32> -> vector<16x16xf32>
    %47 = arith.addf %39, %46 : vector<16x16xf32>
    %c0_40 = arith.constant 0 : index
    %c0_41 = arith.constant 0 : index
    %c0_42 = arith.constant 0 : index
    %48 = vector.load %arg12[%c0_40, %c0_41, %c0_42] : memref<1x16x16xf32, #tpu.memory_space<vmem>>, vector<1x16x16xf32>
    %49 = vector.shape_cast %48 : vector<1x16x16xf32> to vector<16x16xf32>
    %50 = vector.shape_cast %47 : vector<16x16xf32> to vector<1x16x16xf32>
    tpu.vector_store %arg12[%c0_40, %c0_41, %c0_42], %50 {strides = array<i32>} : memref<1x16x16xf32, #tpu.memory_space<vmem>>, vector<1x16x16xf32>,
    %c0_43 = arith.constant 0 : index
    %c0_44 = arith.constant 0 : index
    %51 = vector.load %arg4[%c0_43, %c0_44] : memref<16x16xf32, #tpu.memory_space<vmem>>, vector<16x16xf32>
    %cst_45 = arith.constant dense<0.000000e+00> : vector<16x16xf32>
    %52 = tpu.matmul %47, %51, %cst_45 {dimension_numbers = #tpu.dot_dimension_numbers<[1], [0], [0], [1], [0, 0, 1, 1], [], []>} : vector<16x16xf32>, vector<16x16xf32>, vector<16x16xf32> -> vector<16x16xf32>
    %53 = arith.subf %47, %52 : vector<16x16xf32>
    %54 = arith.mulf %53, %53 : vector<16x16xf32>
    %cst_46 = arith.constant dense<0.000000e+00> : vector<16x16xf32>
    %55 = tpu.matmul %54, %51, %cst_46 {dimension_numbers = #tpu.dot_dimension_numbers<[1], [0], [0], [1], [0, 0, 1, 1], [], []>} : vector<16x16xf32>, vector<16x16xf32>, vector<16x16xf32> -> vector<16x16xf32>
    %cst_47 = arith.constant 9.99999974E-6 : f32
    %56 = vector.broadcast %cst_47 : f32 to vector<16x16xf32>
    %57 = arith.addf %55, %56 : vector<16x16xf32>
    %58 = math.rsqrt %57 : vector<16x16xf32>
    %59 = arith.mulf %53, %58 : vector<16x16xf32>
    %60 = arith.truncf %59 : vector<16x16xf32> to vector<16x16xbf16>
    %c0_48 = arith.constant 0 : index
    %c0_49 = arith.constant 0 : index
    %61 = vector.load %arg11[%c0_48, %c0_49] : memref<2x8xf32, #tpu.memory_space<vmem>>, vector<1x8xf32>
    %c1_50 = arith.constant 1 : index
    %c0_51 = arith.constant 0 : index
    %62 = vector.load %arg11[%c1_50, %c0_51] : memref<2x8xf32, #tpu.memory_space<vmem>>, vector<1x8xf32>
    %c0_52 = arith.constant 0 : index
    %c0_53 = arith.constant 0 : index
    %63 = vector.load %arg8[%c0_52, %c0_53] : memref<16x8xbf16, #tpu.memory_space<vmem>>, vector<16x8xbf16>
    %cst_54 = arith.constant dense<0.000000e+00> : vector<16x8xf32>
    %64 = tpu.matmul %60, %63, %cst_54 {dimension_numbers = #tpu.dot_dimension_numbers<[1], [0], [0], [1], [0, 0, 1, 1], [], []>} : vector<16x16xbf16>, vector<16x8xbf16>, vector<16x8xf32> -> vector<16x8xf32>
    %65 = vector.broadcast %61 : vector<1x8xf32> to vector<16x8xf32>
    %66 = arith.addf %64, %65 : vector<16x8xf32>
    %cst_55 = arith.constant 5.000000e-01 : f32
    %67 = vector.broadcast %cst_55 : f32 to vector<16x8xf32>
    %68 = arith.mulf %67, %66 : vector<16x8xf32>
    %cst_56 = arith.constant 4.471500e-02 : f32
    %69 = vector.broadcast %cst_56 : f32 to vector<16x8xf32>
    %70 = arith.mulf %69, %66 : vector<16x8xf32>
    %71 = arith.mulf %70, %66 : vector<16x8xf32>
    %72 = arith.mulf %71, %66 : vector<16x8xf32>
    %73 = arith.addf %66, %72 : vector<16x8xf32>
    %cst_57 = arith.constant 0.797884583 : f32
    %74 = vector.broadcast %cst_57 : f32 to vector<16x8xf32>
    %75 = arith.mulf %74, %73 : vector<16x8xf32>
    %76 = math.tanh %75 : vector<16x8xf32>
    %cst_58 = arith.constant 1.000000e+00 : f32
    %77 = vector.broadcast %cst_58 : f32 to vector<16x8xf32>
    %78 = arith.addf %77, %76 : vector<16x8xf32>
    %79 = arith.mulf %68, %78 : vector<16x8xf32>
    %80 = arith.truncf %79 : vector<16x8xf32> to vector<16x8xbf16>
    %81 = vector.broadcast %62 : vector<1x8xf32> to vector<64x8xf32>
    %82 = arith.addf %1, %81 : vector<64x8xf32>
    %c0_59 = arith.constant 0 : index
    %c0_60 = arith.constant 0 : index
    %c0_61 = arith.constant 0 : index
    %83 = vector.load %arg9[%c0_59, %c0_60, %c0_61] : memref<4x8x8xbf16, #tpu.memory_space<vmem>>, vector<1x8x8xbf16>
    %84 = vector.shape_cast %83 : vector<1x8x8xbf16> to vector<8x8xbf16>
    %cst_62 = arith.constant dense<0.000000e+00> : vector<16x8xf32>
    %85 = tpu.matmul %80, %84, %cst_62 {dimension_numbers = #tpu.dot_dimension_numbers<[1], [0], [0], [1], [0, 0, 1, 1], [], []>} : vector<16x8xbf16>, vector<8x8xbf16>, vector<16x8xf32> -> vector<16x8xf32>
    %c0_63 = arith.constant 0 : index
    %c0_64 = arith.constant 0 : index
    %c0_65 = arith.constant 0 : index
    %86 = vector.load %arg10[%c0_63, %c0_64, %c0_65] : memref<4x64x16xbf16, #tpu.memory_space<vmem>>, vector<1x64x16xbf16>
    %87 = vector.shape_cast %86 : vector<1x64x16xbf16> to vector<64x16xbf16>
    %88 = arith.truncf %85 : vector<16x8xf32> to vector<16x8xbf16>
    %cst_66 = arith.constant dense<0.000000e+00> : vector<64x8xf32>
    %89 = tpu.matmul %87, %88, %cst_66 {dimension_numbers = #tpu.dot_dimension_numbers<[1], [0], [0], [1], [0, 0, 1, 1], [], []>} : vector<64x16xbf16>, vector<16x8xbf16>, vector<64x8xf32> -> vector<64x8xf32>
    %90 = arith.addf %82, %89 : vector<64x8xf32>
    %c1_67 = arith.constant 1 : index
    %c0_68 = arith.constant 0 : index
    %c0_69 = arith.constant 0 : index
    %91 = vector.load %arg9[%c1_67, %c0_68, %c0_69] : memref<4x8x8xbf16, #tpu.memory_space<vmem>>, vector<1x8x8xbf16>
    %92 = vector.shape_cast %91 : vector<1x8x8xbf16> to vector<8x8xbf16>
    %cst_70 = arith.constant dense<0.000000e+00> : vector<16x8xf32>
    %93 = tpu.matmul %80, %92, %cst_70 {dimension_numbers = #tpu.dot_dimension_numbers<[1], [0], [0], [1], [0, 0, 1, 1], [], []>} : vector<16x8xbf16>, vector<8x8xbf16>, vector<16x8xf32> -> vector<16x8xf32>
    %c1_71 = arith.constant 1 : index
    %c0_72 = arith.constant 0 : index
    %c0_73 = arith.constant 0 : index
    %94 = vector.load %arg10[%c1_71, %c0_72, %c0_73] : memref<4x64x16xbf16, #tpu.memory_space<vmem>>, vector<1x64x16xbf16>
    %95 = vector.shape_cast %94 : vector<1x64x16xbf16> to vector<64x16xbf16>
    %96 = arith.truncf %93 : vector<16x8xf32> to vector<16x8xbf16>
    %cst_74 = arith.constant dense<0.000000e+00> : vector<64x8xf32>
    %97 = tpu.matmul %95, %96, %cst_74 {dimension_numbers = #tpu.dot_dimension_numbers<[1], [0], [0], [1], [0, 0, 1, 1], [], []>} : vector<64x16xbf16>, vector<16x8xbf16>, vector<64x8xf32> -> vector<64x8xf32>
    %98 = arith.addf %90, %97 : vector<64x8xf32>
    %c2_75 = arith.constant 2 : index
    %c0_76 = arith.constant 0 : index
    %c0_77 = arith.constant 0 : index
    %99 = vector.load %arg9[%c2_75, %c0_76, %c0_77] : memref<4x8x8xbf16, #tpu.memory_space<vmem>>, vector<1x8x8xbf16>
    %100 = vector.shape_cast %99 : vector<1x8x8xbf16> to vector<8x8xbf16>
    %cst_78 = arith.constant dense<0.000000e+00> : vector<16x8xf32>
    %101 = tpu.matmul %80, %100, %cst_78 {dimension_numbers = #tpu.dot_dimension_numbers<[1], [0], [0], [1], [0, 0, 1, 1], [], []>} : vector<16x8xbf16>, vector<8x8xbf16>, vector<16x8xf32> -> vector<16x8xf32>
    %c2_79 = arith.constant 2 : index
    %c0_80 = arith.constant 0 : index
    %c0_81 = arith.constant 0 : index
    %102 = vector.load %arg10[%c2_79, %c0_80, %c0_81] : memref<4x64x16xbf16, #tpu.memory_space<vmem>>, vector<1x64x16xbf16>
    %103 = vector.shape_cast %102 : vector<1x64x16xbf16> to vector<64x16xbf16>
    %104 = arith.truncf %101 : vector<16x8xf32> to vector<16x8xbf16>
    %cst_82 = arith.constant dense<0.000000e+00> : vector<64x8xf32>
    %105 = tpu.matmul %103, %104, %cst_82 {dimension_numbers = #tpu.dot_dimension_numbers<[1], [0], [0], [1], [0, 0, 1, 1], [], []>} : vector<64x16xbf16>, vector<16x8xbf16>, vector<64x8xf32> -> vector<64x8xf32>
    %106 = arith.addf %98, %105 : vector<64x8xf32>
    %c3_83 = arith.constant 3 : index
    %c0_84 = arith.constant 0 : index
    %c0_85 = arith.constant 0 : index
    %107 = vector.load %arg9[%c3_83, %c0_84, %c0_85] : memref<4x8x8xbf16, #tpu.memory_space<vmem>>, vector<1x8x8xbf16>
    %108 = vector.shape_cast %107 : vector<1x8x8xbf16> to vector<8x8xbf16>
    %cst_86 = arith.constant dense<0.000000e+00> : vector<16x8xf32>
    %109 = tpu.matmul %80, %108, %cst_86 {dimension_numbers = #tpu.dot_dimension_numbers<[1], [0], [0], [1], [0, 0, 1, 1], [], []>} : vector<16x8xbf16>, vector<8x8xbf16>, vector<16x8xf32> -> vector<16x8xf32>
    %c3_87 = arith.constant 3 : index
    %c0_88 = arith.constant 0 : index
    %c0_89 = arith.constant 0 : index
    %110 = vector.load %arg10[%c3_87, %c0_88, %c0_89] : memref<4x64x16xbf16, #tpu.memory_space<vmem>>, vector<1x64x16xbf16>
    %111 = vector.shape_cast %110 : vector<1x64x16xbf16> to vector<64x16xbf16>
    %112 = arith.truncf %109 : vector<16x8xf32> to vector<16x8xbf16>
    %cst_90 = arith.constant dense<0.000000e+00> : vector<64x8xf32>
    %113 = tpu.matmul %111, %112, %cst_90 {dimension_numbers = #tpu.dot_dimension_numbers<[1], [0], [0], [1], [0, 0, 1, 1], [], []>} : vector<64x16xbf16>, vector<16x8xbf16>, vector<64x8xf32> -> vector<64x8xf32>
    %114 = arith.addf %106, %113 : vector<64x8xf32>
    %c0_91 = arith.constant 0 : index
    %c0_92 = arith.constant 0 : index
    %c0_93 = arith.constant 0 : index
    %115 = vector.load %arg13[%c0_91, %c0_92, %c0_93] : memref<1x64x8xf32, #tpu.memory_space<vmem>>, vector<1x64x8xf32>
    %116 = vector.shape_cast %115 : vector<1x64x8xf32> to vector<64x8xf32>
    %117 = vector.shape_cast %114 : vector<64x8xf32> to vector<1x64x8xf32>
    tpu.vector_store %arg13[%c0_91, %c0_92, %c0_93], %117 {strides = array<i32>} : memref<1x64x8xf32, #tpu.memory_space<vmem>>, vector<1x64x8xf32>,
    return
  }
  func.func @transform_0(%arg0: i32) -> (i32, i32, i32) {
    %c0_i32 = arith.constant 0 : i32
    %c0_i32_0 = arith.constant 0 : i32
    %c0_i32_1 = arith.constant 0 : i32
    return %arg0, %c0_i32, %c0_i32_0 : i32, i32, i32
  }
  func.func @transform_1(%arg0: i32) -> (i32, i32, i32) {
    %c0_i32 = arith.constant 0 : i32
    %c0_i32_0 = arith.constant 0 : i32
    %c0_i32_1 = arith.constant 0 : i32
    return %arg0, %c0_i32, %c0_i32_0 : i32, i32, i32
  }
  func.func @transform_2(%arg0: i32) -> (i32, i32) {
    %c0_i32 = arith.constant 0 : i32
    %c0_i32_0 = arith.constant 0 : i32
    %c0_i32_1 = arith.constant 0 : i32
    return %c0_i32, %c0_i32_0 : i32, i32
  }
  func.func @transform_3(%arg0: i32) -> (i32, i32) {
    %c0_i32 = arith.constant 0 : i32
    %c0_i32_0 = arith.constant 0 : i32
    %c0_i32_1 = arith.constant 0 : i32
    return %c0_i32, %c0_i32_0 : i32, i32
  }
  func.func @transform_4(%arg0: i32) -> (i32, i32, i32) {
    %c0_i32 = arith.constant 0 : i32
    %c0_i32_0 = arith.constant 0 : i32
    %c0_i32_1 = arith.constant 0 : i32
    %c0_i32_2 = arith.constant 0 : i32
    return %c0_i32, %c0_i32_0, %c0_i32_1 : i32, i32, i32
  }
  func.func @transform_5(%arg0: i32) -> (i32, i32, i32) {
    %c0_i32 = arith.constant 0 : i32
    %c0_i32_0 = arith.constant 0 : i32
    %c0_i32_1 = arith.constant 0 : i32
    %c0_i32_2 = arith.constant 0 : i32
    return %c0_i32, %c0_i32_0, %c0_i32_1 : i32, i32, i32
  }
  func.func @transform_6(%arg0: i32) -> (i32, i32) {
    %c0_i32 = arith.constant 0 : i32
    %c0_i32_0 = arith.constant 0 : i32
    %c0_i32_1 = arith.constant 0 : i32
    return %c0_i32, %c0_i32_0 : i32, i32
  }
  func.func @transform_7(%arg0: i32) -> (i32, i32) {
    %c0_i32 = arith.constant 0 : i32
    %c0_i32_0 = arith.constant 0 : i32
    %c0_i32_1 = arith.constant 0 : i32
    return %c0_i32, %c0_i32_0 : i32, i32
  }
  func.func @transform_8(%arg0: i32) -> (i32, i32, i32) {
    %c0_i32 = arith.constant 0 : i32
    %c0_i32_0 = arith.constant 0 : i32
    %c0_i32_1 = arith.constant 0 : i32
    %c0_i32_2 = arith.constant 0 : i32
    return %c0_i32, %c0_i32_0, %c0_i32_1 : i32, i32, i32
  }
  func.func @transform_9(%arg0: i32) -> (i32, i32, i32) {
    %c0_i32 = arith.constant 0 : i32
    %c0_i32_0 = arith.constant 0 : i32
    %c0_i32_1 = arith.constant 0 : i32
    %c0_i32_2 = arith.constant 0 : i32
    return %c0_i32, %c0_i32_0, %c0_i32_1 : i32, i32, i32
  }
  func.func @transform_10(%arg0: i32) -> (i32, i32) {
    %c0_i32 = arith.constant 0 : i32
    %c0_i32_0 = arith.constant 0 : i32
    %c0_i32_1 = arith.constant 0 : i32
    return %c0_i32, %c0_i32_0 : i32, i32
  }
  func.func @transform_11(%arg0: i32) -> (i32, i32, i32) {
    %c0_i32 = arith.constant 0 : i32
    %c0_i32_0 = arith.constant 0 : i32
    %c0_i32_1 = arith.constant 0 : i32
    return %arg0, %c0_i32, %c0_i32_0 : i32, i32, i32
  }
  func.func @transform_12(%arg0: i32) -> (i32, i32, i32) {
    %c0_i32 = arith.constant 0 : i32
    %c0_i32_0 = arith.constant 0 : i32
    %c0_i32_1 = arith.constant 0 : i32
    return %arg0, %c0_i32, %c0_i32_0 : i32, i32, i32
  }
}

</mosaic_0001>

<bundles_post_ra>
// kernel: fused_block_forward.1
= control target key start
LH: loop header
LB: loop body
LE: loop exit
PB: predicated region body
PF: predicated region fallthrough
CT: control target
= control target key end

     0   :  { %s2717_s21 = smov 0   ;;  %s3072_s0 = inlined_call_operand.vmem [shape: f32[2,16,16], index: 0, kind: input, shape index: {}, may-alias: {0,11}]   ;;  %s3073_s1 = inlined_call_operand.vmem [shape: f32[2,64,8], index: 1, kind: input, shape index: {}, may-alias: {1,12}]   ;;  %s3074_s2 = inlined_call_operand.vmem [shape: f32[8,8], index: 2, kind: input, shape index: {}]   ;;  %s3075_s3 = inlined_call_operand.vmem [shape: f32[16,16], index: 3, kind: input, shape index: {}]   ;;  %s3076_s4 = inlined_call_operand.vmem [shape: bf16[4,16,64], index: 4, kind: input, shape index: {}]   ;;  %s3077_s5 = inlined_call_operand.vmem [shape: bf16[4,8,16], index: 5, kind: input, shape index: {}]   ;;  %s3078_s6 = inlined_call_operand.vmem [shape: f32[16,16], index: 6, kind: input, shape index: {}]   ;;  %s3079_s7 = inlined_call_operand.vmem [shape: bf16[16,8], index: 7, kind: input, shape index: {}]   ;;  %s3080_s8 = inlined_call_operand.vmem [shape: bf16[4,8,8], index: 8, kind: input, shape index: {}]   ;;  %s3081_s9 = inlined_call_operand.vmem [shape: bf16[4,64,16], index: 9, kind: input, shape index: {}]   ;;  %s3082_s10 = inlined_call_operand.vmem [shape: f32[2,8], index: 10, kind: input, shape index: {}]   ;;  %s3083_s11 = inlined_call_operand.vmem [shape: f32[2,16,16], index: 11, kind: output, shape index: {0}, may-alias: {0,11}]   ;;  %s3084_s12 = inlined_call_operand.vmem [shape: f32[2,64,8], index: 12, kind: output, shape index: {1}, may-alias: {1,12}]  }
   0x1 LB: > { %s2192_s22 = sadd.s32 4294967295, %s2648_s21   ;;  %p2196_p0 = scmp.ge.s32.totalorder %s2648_s21, 1  ;;  %s2648_s21 = sphi %s2717_s21, %s23_s21  }
   0x2   : > { %p375_p1 = scmp.lt.s32.totalorder %s2648_s21, 3 }
   0x4   : > { %p376_p2 = pnand %p2196_p0, %p375_p1 }
   0x5   : > { %p427_p3 = scmp.lt.s32.totalorder (!%p376_p2), %s2192_s22, 1 }
   0x6   : > { %379 = sbr.rel (%p376_p2) target bundleno = 2586 (0xa1a), region = 64 }
   0xb   : > { %v456_v0 = vld [vmem:[%s3074_s2] sm:$0xff]  ;;  %s3086_s22 = smov (!%p427_p3, %s2192_s22), 1  ;;  %vm457_vm0 = vcmask 64512   ;;  %v2650_v33 = vmov 0.0   ;;  %vm2651_vm1 = vmmov 0   ;;  %vm765_vm2 = vcmask 523264  }
   0xc   : > { %2403 = vmatprep.subr.mxu0 %v456_v0  ;;  %2417 = vmatprep.subr.mxu1 %v456_v0  ;;  %s2316_s25 = sshll.u32 %s3086_s22, 6  ;;  %vm815_vm3 = vcmask 1043456   ;;  %s2315_s26 = sshll.u32 %s3086_s22, 4  ;;  %vm1174_vm4 = vcmask 130048  }
   0xd   : > { %2404 = vmatpush3.msra.mxu0 %v456_v0  ;;  %2418 = vmatpush3.msra.mxu1 %v456_v0  ;;  %s436_s28 = scalar_lea.vmem %s3073_s1, %s2316_s25  ;;  %s431_s29 = scalar_lea.vmem %s3072_s0, %s2315_s26 }
   0xe   : > { %v2736_v1 = vld [vmem:[%s436_s28] sm:$0xff]  ;;  %v2738_v2 = vld [vmem:[%s436_s28 + $0x8] sm:$0xff]  ;;  %v2740_v3 = vld [vmem:[%s436_s28 + $0x10] sm:$0xff]  ;;  %2431 = vmatprep.subr.bf16.mxu0 %v2650_v33  ;;  %2443 = vmatprep.subr.bf16.mxu1 %v2650_v33  ;;  %s441_s30 = scalar_lea.vmem %s3083_s11, %s2315_s26  ;;  %s3051_s15 = scalar_lea.vmem %s3084_s12, %s2316_s25 }
   0xf   : > { %2405 = vmatprep.mubr.msk.f32.mxu0 %vm457_vm0, %v2736_v1  ;;  %v2746_v4 = vld [vmem:[%s436_s28 + $0x18] sm:$0xff]  ;;  %v2748_v5 = vld [vmem:[%s436_s28 + $0x20] sm:$0xff]  ;;  %v2752_v6 = vld [vmem:[%s436_s28 + $0x28] sm:$0xff] }
  0x10   : > { %2406 = vmatmul.mubr.msk.f32.vlgmr.msra.gmra.mxu0 %vm457_vm0, %v2738_v2  ;;  %v2756_v7 = vld [vmem:[%s436_s28 + $0x30] sm:$0xff]  ;;  %v2760_v8 = vld [vmem:[%s436_s28 + $0x38] sm:$0xff] }
  0x11   : > { %2408 = vmatprep.mubr.msk.f32.mxu0 %vm457_vm0, %v2740_v3 }
  0x14   : > { %2409 = vmatmul.mubr.msk.f32.gmra.mxu0 %vm457_vm0, %v2746_v4 }
  0x15   : > { %2411 = vmatprep.mubr.msk.f32.mxu0 %vm457_vm0, %v2748_v5 }
  0x18   : > { %2412 = vmatmul.mubr.msk.f32.gmra.mxu0 %vm457_vm0, %v2752_v6 }
  0x19   : > { %2414 = vmatprep.mubr.msk.f32.mxu0 %vm457_vm0, %v2756_v7 }
  0x1c   : > { %2415 = vmatmul.mubr.msk.f32.gmra.mxu0 %vm457_vm0, %v2760_v8 }
  0x1d   : > { %2439 = vmatprep.mubr.msk.bf16.mxu0 %vm2651_vm1, %v2650_v33 }
  0xd0   : > { %v2407_v9 = vpop.f32.mrf.mxu0 }
  0xd1   : > { %v2769_v10 = vsub.f32 %v2738_v2, %v2407_v9 }
  0xd2   : > { %v548_v11 = vpop.f32.mrf.mxu0 }
  0xd3   : > { %v2772_v12 = vsub.f32 %v2736_v1, %v548_v11  ;;  %v596_v15 = vmul.f32 %v2769_v10, %v2769_v10 }
  0xd4   : > { %v2410_v13 = vpop.f32.mrf.mxu0 }
  0xd5   : > { %v595_v14 = vmul.f32 %v2772_v12, %v2772_v12  ;;  %v2779_v16 = vsub.f32 %v2746_v4, %v2410_v13 }
  0xd6   : > { %v558_v17 = vpop.f32.mrf.mxu0 }
  0xd7   : > { %v2782_v18 = vsub.f32 %v2740_v3, %v558_v17  ;;  %2419 = vmatprep.mubr.msk.f32.mxu1 %vm457_vm0, %v595_v14  ;;  %v598_v21 = vmul.f32 %v2779_v16, %v2779_v16  ;;  %v2597_v17 = vld [vmem:[%s3076_s4] sm:$0xff]  }
  0xd8   : > { %v2413_v19 = vpop.f32.mrf.mxu0  ;;  %2420 = vmatmul.mubr.msk.f32.vlgmr.msra.gmra.mxu1 %vm457_vm0, %v596_v15 }
  0xd9   : > { %v597_v20 = vmul.f32 %v2782_v18, %v2782_v18  ;;  %v592_v22 = vsub.f32 %v2752_v6, %v2413_v19 }
  0xda   : > { %v568_v23 = vpop.f32.mrf.mxu0 }
  0xdb   : > { %v591_v24 = vsub.f32 %v2748_v5, %v568_v23  ;;  %2422 = vmatprep.mubr.msk.f32.mxu1 %vm457_vm0, %v597_v20  ;;  %v600_v27 = vmul.f32 %v592_v22, %v592_v22  ;;  %v2228_v20 = vld [vmem:[%s3077_s5 + $0x4] sm:$0xf] }
  0xdc   : > { %v2416_v25 = vpop.f32.mrf.mxu0  ;;  %2423 = vmatmul.mubr.msk.f32.gmra.mxu1 %vm457_vm0, %v598_v21  ;;  %v921_v23 = vsel %vm815_vm3, %v2228_v20, 0 }
  0xdd   : > { %v599_v26 = vmul.f32 %v591_v24, %v591_v24  ;;  %v594_v28 = vsub.f32 %v2760_v8, %v2416_v25 }
  0xde   : > { %v578_v29 = vpop.f32.mrf.mxu0 }
  0xdf   : > { %v593_v30 = vsub.f32 %v2756_v7, %v578_v29  ;;  %2425 = vmatprep.mubr.msk.f32.mxu1 %vm457_vm0, %v599_v26  ;;  %v602_v32 = vmul.f32 %v594_v28, %v594_v28 }
  0xe0   : > { %2426 = vmatmul.mubr.msk.f32.gmra.mxu1 %vm457_vm0, %v600_v27 }
  0xe1   : > { %v601_v31 = vmul.f32 %v593_v30, %v593_v30 }
  0xe3   : > { %2428 = vmatprep.mubr.msk.f32.mxu1 %vm457_vm0, %v601_v31  ;;  %v2234_v31 = vld [vmem:[%s3077_s5 + $0x8] sm:$0xf] }
  0xe4   : > { %2429 = vmatmul.mubr.msk.f32.gmra.mxu1 %vm457_vm0, %v602_v32  ;;  %v1025_v32 = vsel %vm815_vm3, %v2234_v31, 0 }
  0xe5   : > { %2445 = vmatprep.mubr.msk.bf16.mxu1 %vm2651_vm1, %v2650_v33 }
 0x198   : > { %v2421_v34 = vpop.f32.mrf.mxu1 }
 0x199   : > { %v699_v49 = vadd.f32 1e-06, %v2421_v34 }
 0x19a   : > { %v693_v35 = vpop.f32.mrf.mxu1 }
 0x19b   : > { %v694_v48 = vadd.f32 1e-06, %v693_v35 }
 0x19c   : > { %v2424_v36 = vpop.f32.mrf.mxu1 }
 0x19d   : > { %v709_v47 = vadd.f32 1e-06, %v2424_v36 }
 0x19e   : > { %v703_v37 = vpop.f32.mrf.mxu1 }
 0x19f   : > { %v704_v46 = vadd.f32 1e-06, %v703_v37 }
 0x1a0   : > { %v2427_v38 = vpop.f32.mrf.mxu1 }
 0x1a1   : > { %v719_v44 = vadd.f32 1e-06, %v2427_v38  ;;  %v752_v38 = vld [vmem:[%s431_s29] sm:$0xff] }
 0x1a2   : > { %v713_v39 = vpop.f32.mrf.mxu1 }
 0x1a3   : > { %v714_v40 = vadd.f32 1e-06, %v713_v39  ;;  %v754_v39 = vld [vmem:[%s3078_s6] sm:$0xff] }
 0x1a4   : > { %v2430_v41 = vpop.f32.mrf.mxu1 }
 0x1a5   : > { %v729_v42 = vadd.f32 1e-06, %v2430_v41  ;;  %v753_v41 = vld [vmem:[%s431_s29 + $0x8] sm:$0xff] }
 0x1a6   : > { %v723_v43 = vpop.f32.mrf.mxu1 }
 0x1a7   : > { %2618 = vrsqrt.f32 %v729_v42  ;;  %v724_v45 = vadd.f32 1e-06, %v723_v43  ;;  %v755_v42 = vld [vmem:[%s3078_s6 + $0x8] sm:$0xff] }
 0x1a8   : > { %2620 = vrsqrt.f32 %v714_v40  ;;  %v756_v40 = vadd.f32 %v754_v39, %v752_v38 }
 0x1a9   : > { %2622 = vrsqrt.f32 %v724_v45 }
 0x1aa   : > { %2624 = vrsqrt.f32 %v719_v44  ;;  %v757_v44 = vadd.f32 %v755_v42, %v753_v41  ;;  %v2246_v42 = vld [vmem:[%s3082_s10] ss:$0 sm:$0xff] }
 0x1ab   : > { %2626 = vrsqrt.f32 %v704_v46 }
 0x1ac   : > { %2628 = vrsqrt.f32 %v709_v47 }
 0x1ad   : > { %2630 = vrsqrt.f32 %v694_v48 }
 0x1ae   : > { %2632 = vrsqrt.f32 %v699_v49 }
 0x1b4   : > { %v2619_v50 = vpop.eup %2618 }
 0x1b5   : > { %v2621_v51 = vpop.eup %2620  ;;  %v747_v54 = vmul.f32 %v2619_v50, %v594_v28 }
 0x1b6   : > { %v2623_v52 = vpop.eup %2622  ;;  %v744_v57 = vmul.f32 %v2621_v51, %v591_v24 }
 0x1b7   : > { %v746_v53 = vmul.f32 %v2623_v52, %v593_v30  ;;  %v2625_v55 = vpop.eup %2624  ;;  %v2599_v30 = vld [vmem:[%s3076_s4 + $0x10] sm:$0xff]  }
 0x1b8   : > { %v2627_v58 = vpop.eup %2626  ;;  %v745_v59 = vmul.f32 %v2625_v55, %v592_v22 }
 0x1b9   : > { %v2806_v56 = vpack.c.bf16 %v747_v54, %v746_v53  ;;  %v2629_v60 = vpop.eup %2628  ;;  %v742_v62 = vmul.f32 %v2627_v58, %v2782_v18  ;;  %v2600_v58 = vld [vmem:[%s3076_s4 + $0x18] sm:$0xff]  }
 0x1ba   : > { %v2810_v61 = vpack.c.bf16 %v745_v59, %v744_v57  ;;  %v2631_v63 = vpop.eup %2630  ;;  %v743_v0 = vmul.f32 %v2629_v60, %v2779_v16 }
 0x1bb   : > { %2432 = vmatpush3.bf16.msra.mxu0 %v2806_v56  ;;  %v2633_v9 = vpop.eup %2632  ;;  %v740_v13 = vmul.f32 %v2631_v63, %v2772_v12  ;;  %v811_v12 = vld [vmem:[%s3077_s5] sm:$0xf] }
 0x1bc   : > { %2433 = vmatprep.subr.bf16.mxu0 %v2650_v33  ;;  %v2816_v11 = vpack.c.bf16 %v743_v0, %v742_v62  ;;  %v741_v14 = vmul.f32 %v2633_v9, %v2769_v10  ;;  %v2598_v10 = vld [vmem:[%s3076_s4 + $0x8] sm:$0xff]   ;;  %v817_v16 = vsel %vm815_vm3, %v811_v12, 0  ;;  %v1177_v12 = vld [vmem:[%s3075_s3] sm:$0xff] }
 0x1bd   : > { %2444 = vmatpush3.bf16.msra.mxu1 %v817_v16 }
 0x1be   : > { %v2822_v15 = vpack.c.bf16 %v741_v14, %v740_v13  ;;  %2461 = vmatprep.subr.bf16.mxu1 %v2650_v33 }
 0x1bf   : > { %2434 = vmatpush3.bf16.msra.mxu0 %v2810_v61 }
 0x1c0   : > { %2435 = vmatprep.subr.bf16.mxu0 %v2650_v33 }
 0x1c3   : > { %2436 = vmatpush3.bf16.msra.mxu0 %v2816_v11 }
 0x1c4   : > { %2437 = vmatprep.subr.bf16.mxu0 %v2650_v33 }
 0x1c7   : > { %2438 = vmatpush3.bf16.msra.mxu0 %v2822_v15 }
 0x1c8   : > { %2449 = vmatprep.subr.bf16.mxu0 %v2650_v33 }
 0x1ca   : > { %2440 = vmatmul.mubr.msk.bf16.vlgmr.msra.gmra.mxu0 %vm765_vm2, %v2597_v17 }
 0x1cb   : > { %2450 = vmatpush3.bf16.msra.mxu0 %v2806_v56  ;;  %2457 = vmatprep.mubr.msk.bf16.mxu0 %vm2651_vm1, %v2650_v33 }
 0x1cc   : > { %2451 = vmatprep.subr.bf16.mxu0 %v2650_v33 }
 0x1cf   : > { %2452 = vmatpush3.bf16.msra.mxu0 %v2810_v61 }
 0x1d0   : > { %2453 = vmatprep.subr.bf16.mxu0 %v2650_v33 }
 0x1d3   : > { %2454 = vmatpush3.bf16.msra.mxu0 %v2816_v11 }
 0x1d4   : > { %2455 = vmatprep.subr.bf16.mxu0 %v2650_v33 }
 0x1d7   : > { %2456 = vmatpush3.bf16.msra.mxu0 %v2822_v15 }
 0x1d8   : > { %2479 = vmatprep.subr.bf16.mxu0 %v2650_v33 }
 0x1da   : > { %2458 = vmatmul.mubr.msk.bf16.vlgmr.msra.gmra.mxu0 %vm765_vm2, %v2598_v10  ;;  %v1178_v10 = vld [vmem:[%s3075_s3 + $0x8] sm:$0xff] }
 0x1db   : > { %2481 = vmatprep.mubr.msk.bf16.mxu0 %vm2651_vm1, %v2650_v33  ;;  %2480 = vmatpush3.bf16.msra.mxu0 %v1025_v32 }
 0x1dc   : > { %2485 = vmatprep.subr.bf16.mxu0 %v2650_v33 }
 0x28a   : > { %v803_v18 = vpop.f32.mrf.mxu0 }
 0x28c   : > { %v2441_v19 = vpop.f32.mrf.mxu0 }
 0x28e   : > { %v806_v21 = vpop.f32.mrf.mxu0 }
 0x28f   : > { %v810_v22 = vpack.c.bf16 %v806_v21, %v803_v18 }
 0x290   : > { %v2442_v24 = vpop.f32.mrf.mxu0 }
 0x291   : > { %2446 = vmatmul.mubr.msk.bf16.vlgmr.msra.gmra.mxu1 %vm457_vm0, %v810_v22 }
 0x292   : > { %2462 = vmatpush3.bf16.msra.mxu1 %v921_v23  ;;  %2463 = vmatprep.mubr.msk.bf16.mxu1 %vm2651_vm1, %v2650_v33 }
 0x293   : > { %2467 = vmatprep.subr.bf16.mxu1 %v2650_v33 }
 0x29a   : > { %v907_v25 = vpop.f32.mrf.mxu0 }
 0x29c   : > { %v2459_v26 = vpop.f32.mrf.mxu0 }
 0x29e   : > { %v910_v27 = vpop.f32.mrf.mxu0 }
 0x29f   : > { %v914_v28 = vpack.c.bf16 %v910_v27, %v907_v25 }
 0x2a0   : > { %v2460_v29 = vpop.f32.mrf.mxu0 }
 0x2a1   : > { %2464 = vmatmul.mubr.msk.bf16.vlgmr.msra.gmra.mxu1 %vm457_vm0, %v914_v28  ;;  %v2601_v29 = vld [vmem:[%s3079_s7] sm:$0xff]  }
 0x2a2   : > { %2468 = vmatpush3.bf16.msra.mxu1 %v2806_v56  ;;  %2475 = vmatprep.mubr.msk.bf16.mxu1 %vm2651_vm1, %v2650_v33 }
 0x2a3   : > { %2469 = vmatprep.subr.bf16.mxu1 %v2650_v33 }
 0x2a6   : > { %2470 = vmatpush3.bf16.msra.mxu1 %v2810_v61 }
 0x2a7   : > { %2471 = vmatprep.subr.bf16.mxu1 %v2650_v33 }
 0x2aa   : > { %2472 = vmatpush3.bf16.msra.mxu1 %v2816_v11 }
 0x2ab   : > { %2473 = vmatprep.subr.bf16.mxu1 %v2650_v33 }
 0x2ae   : > { %2474 = vmatpush3.bf16.msra.mxu1 %v2822_v15 }
 0x2af   : > { %2497 = vmatprep.subr.bf16.mxu1 %v2650_v33 }
 0x2b1   : > { %2476 = vmatmul.mubr.msk.bf16.vlgmr.msra.gmra.mxu1 %vm765_vm2, %v2599_v30 }
 0x2b2   : > { %2499 = vmatprep.mubr.msk.bf16.mxu1 %vm2651_vm1, %v2650_v33 }
 0x351   : > { %v853_v34 = vpop.f32.mrf.mxu1 }
 0x352   : > { %v860_v43 = vadd.f32 %v853_v34, %v756_v40  ;;  %v1439_v40 = vld [vmem:[%s3080_s8] sm:$0xf] }
 0x353   : > { %v2447_v35 = vpop.f32.mrf.mxu1  ;;  %v1444_v41 = vsel %vm815_vm3, %v1439_v40, 0 }
 0x355   : > { %v856_v36 = vpop.f32.mrf.mxu1 }
 0x356   : > { %v861_v48 = vadd.f32 %v856_v36, %v757_v44 }
 0x357   : > { %v2448_v37 = vpop.f32.mrf.mxu1 }
 0x361   : > { %v957_v45 = vpop.f32.mrf.mxu1 }
 0x362   : > { %v964_v46 = vadd.f32 %v957_v45, %v860_v43 }
 0x363   : > { %v2465_v47 = vpop.f32.mrf.mxu1 }
 0x365   : > { %v960_v49 = vpop.f32.mrf.mxu1 }
 0x366   : > { %v965_v50 = vadd.f32 %v960_v49, %v861_v48 }
 0x367   : > { %v2466_v51 = vpop.f32.mrf.mxu1 }
 0x371   : > { %v1011_v52 = vpop.f32.mrf.mxu1 }
 0x373   : > { %v2477_v53 = vpop.f32.mrf.mxu1 }
 0x375   : > { %v1014_v54 = vpop.f32.mrf.mxu1 }
 0x376   : > { %v1018_v55 = vpack.c.bf16 %v1014_v54, %v1011_v52 }
 0x377   : > { %v2478_v57 = vpop.f32.mrf.mxu1 }
 0x378   : > { %2482 = vmatmul.mubr.msk.bf16.vlgmr.msra.gmra.mxu0 %vm457_vm0, %v1018_v55 }
 0x379   : > { %2486 = vmatpush3.bf16.msra.mxu0 %v2806_v56  ;;  %2493 = vmatprep.mubr.msk.bf16.mxu0 %vm2651_vm1, %v2650_v33  ;;  %v2240_v56 = vld [vmem:[%s3077_s5 + $0xc] sm:$0xf] }
 0x37a   : > { %2487 = vmatprep.subr.bf16.mxu0 %v2650_v33  ;;  %v1129_v59 = vsel %vm815_vm3, %v2240_v56, 0 }
 0x37b   : > { %2498 = vmatpush3.bf16.msra.mxu1 %v1129_v59 }
 0x37c   : > { %2510 = vmatprep.subr.mxu1 %v1178_v10 }
 0x37d   : > { %2488 = vmatpush3.bf16.msra.mxu0 %v2810_v61 }
 0x37e   : > { %2489 = vmatprep.subr.bf16.mxu0 %v2650_v33 }
 0x381   : > { %2490 = vmatpush3.bf16.msra.mxu0 %v2816_v11 }
 0x382   : > { %2491 = vmatprep.subr.bf16.mxu0 %v2650_v33 }
 0x385   : > { %2492 = vmatpush3.bf16.msra.mxu0 %v2822_v15 }
 0x386   : > { %2503 = vmatprep.subr.mxu0 %v1178_v10 }
 0x388   : > { %2494 = vmatmul.mubr.msk.bf16.vlgmr.msra.gmra.mxu0 %vm765_vm2, %v2600_v58 }
 0x389   : > { %2504 = vmatpush3.msra.mxu0 %v1178_v10 }
 0x38a   : > { %2505 = vmatprep.subr.mxu0 %v1177_v12 }
 0x38b   : > { %2506 = vmatpush3.msra.mxu0 %v1177_v12 }
 0x38c   : > { %2517 = vmatprep.subr.bf16.mxu0 %v2650_v33 }
 0x438   : > { %v1061_v60 = vpop.f32.mrf.mxu0 }
 0x439   : > { %v1068_v61 = vadd.f32 %v1061_v60, %v964_v46 }
 0x43a   : > { %v2483_v62 = vpop.f32.mrf.mxu0 }
 0x43c   : > { %v1064_v63 = vpop.f32.mrf.mxu0 }
 0x43d   : > { %v1069_v0 = vadd.f32 %v1064_v63, %v965_v50 }
 0x43e   : > { %v2484_v9 = vpop.f32.mrf.mxu0 }
 0x43f   : > { %v2259_v9 = vld [vmem:[%s3080_s8 + $0x4] sm:$0xf] }
 0x448   : > { %v1115_v11 = vpop.f32.mrf.mxu0 }
 0x44a   : > { %v2495_v13 = vpop.f32.mrf.mxu0 }
 0x44c   : > { %v1118_v14 = vpop.f32.mrf.mxu0 }
 0x44d   : > { %v1122_v15 = vpack.c.bf16 %v1118_v14, %v1115_v11 }
 0x44e   : > { %v2496_v17 = vpop.f32.mrf.mxu0 }
 0x44f   : > { %2500 = vmatmul.mubr.msk.bf16.vlgmr.msra.gmra.mxu1 %vm457_vm0, %v1122_v15  ;;  %v1604_v15 = vsel %vm815_vm3, %v2259_v9, 0  ;;  %v2602_v17 = vld [vmem:[%s3081_s9] sm:$0xff]  }
 0x450   : > { %2511 = vmatpush3.msra.mxu1 %v1178_v10  ;;  %v2605_v10 = vld [vmem:[%s3081_s9 + $0x20] sm:$0xff]  }
 0x451   : > { %2512 = vmatprep.subr.mxu1 %v1177_v12 }
 0x452   : > { %2513 = vmatpush3.msra.mxu1 %v1177_v12 }
 0x453   : > { %2523 = vmatprep.subr.bf16.mxu1 %v2650_v33 }
 0x50f   : > { %v1165_v16 = vpop.f32.mrf.mxu1 }
 0x510   : > { %v1172_v18 = vadd.f32 %v1165_v16, %v1068_v61 }
 0x511   : > { %v2501_v19 = vpop.f32.mrf.mxu1 }
 0x512   : > { %1175 = vst.msk [vmem:[%s441_s30] sm:$0xff] %vm1174_vm4, %v1172_v18  ;;  %2507 = vmatprep.mubr.msk.f32.mxu0 %vm1174_vm4, %v1172_v18 }
 0x513   : > { %v1168_v20 = vpop.f32.mrf.mxu1 }
 0x514   : > { %v1173_v21 = vadd.f32 %v1168_v20, %v1069_v0 }
 0x515   : > { %v2502_v22 = vpop.f32.mrf.mxu1 }
 0x516   : > { %1176 = vst.msk [vmem:[%s441_s30 + $0x8] sm:$0xff] %vm1174_vm4, %v1173_v21  ;;  %2508 = vmatmul.mubr.msk.f32.vlgmr.msra.gmra.mxu0 %vm1174_vm4, %v1173_v21  ;;  %v2603_v22 = vld [vmem:[%s3081_s9 + $0x8] sm:$0xff]  }
 0x517   : > { %2519 = vmatprep.mubr.msk.bf16.mxu0 %vm2651_vm1, %v2650_v33  ;;  %2518 = vmatpush3.bf16.msra.mxu0 %v2601_v29 }
 0x5d6   : > { %v2509_v23 = vpop.f32.mrf.mxu0 }
 0x5d7   : > { %v1261_v24 = vsub.f32 %v1173_v21, %v2509_v23  ;;  %v2277_v21 = vld [vmem:[%s3080_s8 + $0x8] sm:$0xf] }
 0x5d8   : > { %v1251_v25 = vpop.f32.mrf.mxu0 }
 0x5d9   : > { %v1260_v26 = vsub.f32 %v1172_v18, %v1251_v25  ;;  %v1263_v28 = vmul.f32 %v1261_v24, %v1261_v24  ;;  %v1765_v25 = vsel %vm815_vm3, %v2277_v21, 0 }
 0x5db   : > { %v1262_v27 = vmul.f32 %v1260_v26, %v1260_v26 }
 0x5dd   : > { %2514 = vmatprep.mubr.msk.f32.mxu1 %vm1174_vm4, %v1262_v27 }
 0x5de   : > { %2515 = vmatmul.mubr.msk.f32.vlgmr.msra.gmra.mxu1 %vm1174_vm4, %v1263_v28 }
 0x5df   : > { %2525 = vmatprep.mubr.msk.bf16.mxu1 %vm2651_vm1, %v2650_v33  ;;  %2524 = vmatpush3.bf16.msra.mxu1 %v1444_v41 }
 0x5e0   : > { %2539 = vmatprep.subr.bf16.mxu1 %v2650_v33 }
 0x69e   : > { %v2516_v30 = vpop.f32.mrf.mxu1 }
 0x69f   : > { %v1342_v31 = vadd.f32 1e-05, %v2516_v30  ;;  %v2295_v30 = vld [vmem:[%s3080_s8 + $0xc] sm:$0xf] }
 0x6a0   : > { %v1336_v32 = vpop.f32.mrf.mxu1 }
 0x6a1   : > { %2634 = vrsqrt.f32 %v1342_v31  ;;  %v1337_v34 = vadd.f32 1e-05, %v1336_v32  ;;  %v2606_v31 = vld [vmem:[%s3081_s9 + $0x18] sm:$0xff]   ;;  %v2607_v32 = vld [vmem:[%s3081_s9 + $0x28] sm:$0xff]  }
 0x6a3   : > { %2636 = vrsqrt.f32 %v1337_v34  ;;  %v2608_v34 = vld [vmem:[%s3081_s9 + $0x30] sm:$0xff]  }
 0x6ae   : > { %v2635_v35 = vpop.eup %2634 }
 0x6af   : > { %v1348_v38 = vmul.f32 %v2635_v35, %v1261_v24  ;;  %v2604_v24 = vld [vmem:[%s3081_s9 + $0x10] sm:$0xff]   ;;  %v1926_v35 = vsel %vm815_vm3, %v2295_v30, 0  ;;  %v2617_v30 = vld [vmem:[%s3081_s9 + $0x78] sm:$0xff]  }
 0x6b0   : > { %v2637_v36 = vpop.eup %2636 }
 0x6b1   : > { %v1347_v37 = vmul.f32 %v2637_v36, %v1260_v26  ;;  %v2609_v36 = vld [vmem:[%s3081_s9 + $0x38] sm:$0xff]  }
 0x6b3   : > { %v1349_v39 = vpack.c.bf16 %v1348_v38, %v1347_v37  ;;  %v2610_v37 = vld [vmem:[%s3081_s9 + $0x40] sm:$0xff]  }
 0x6b4   : > { %v2613_v38 = vld [vmem:[%s3081_s9 + $0x60] sm:$0xff]  }
 0x6b5   : > { %2520 = vmatmul.mubr.msk.bf16.vlgmr.msra.gmra.mxu0 %vm1174_vm4, %v1349_v39  ;;  %v2249_v39 = vld [vmem:[%s3082_s10 + $0x1] ss:$0 sm:$0xff] }
 0x6b6   : > { %2531 = vmatprep.mubr.msk.bf16.mxu0 %vm1174_vm4, %v2602_v17  ;;  %v1436_v9 = vadd.f32 %v2249_v39, %v2752_v6 }
 0x775   : > { %v1401_v43 = vpop.f32.mrf.mxu0 }
 0x776   : > { %v1402_v44 = vadd.f32 %v2246_v42, %v1401_v43 }
 0x777   : > { %v2521_v45 = vpop.f32.mrf.mxu0 }
 0x778   : > { %v1410_v46 = vmul.f32 0.044715, %v1402_v44  ;;  %v1408_v62 = vmul.f32 0.5, %v1402_v44 }
 0x779   : > { %v1404_v47 = vpop.f32.mrf.mxu0 }
 0x77a   : > { %v1412_v48 = vmul.f32 %v1410_v46, %v1402_v44  ;;  %v1405_v49 = vadd.f32 %v2246_v42, %v1404_v47  ;;  %v1434_v46 = vadd.f32 %v2249_v39, %v2746_v4 }
 0x77b   : > { %v2522_v50 = vpop.f32.mrf.mxu0 }
 0x77c   : > { %v1414_v51 = vmul.f32 %v1412_v48, %v1402_v44  ;;  %v1411_v52 = vmul.f32 0.044715, %v1405_v49  ;;  %v1409_v63 = vmul.f32 0.5, %v1405_v49  ;;  %v1432_v50 = vadd.f32 %v2249_v39, %v2738_v2 }
 0x77e   : > { %v1416_v53 = vadd.f32 %v1414_v51, %v1402_v44  ;;  %v1413_v54 = vmul.f32 %v1411_v52, %v1405_v49  ;;  %v1431_v44 = vadd.f32 %v2249_v39, %v2736_v1  ;;  %v1437_v51 = vadd.f32 %v2249_v39, %v2756_v7 }
 0x77f   : > { %v1435_v1 = vadd.f32 %v2249_v39, %v2748_v5 }
 0x780   : > { %v1418_v55 = vmul.f32 0.7978846, %v1416_v53  ;;  %v1415_v57 = vmul.f32 %v1413_v54, %v1405_v49 }
 0x782   : > { %2638 = vtanh.f32 %v1418_v55  ;;  %v1417_v58 = vadd.f32 %v1415_v57, %v1405_v49 }
 0x784   : > { %v1419_v56 = vmul.f32 0.7978846, %v1417_v58 }
 0x786   : > { %2640 = vtanh.f32 %v1419_v56 }
 0x78f   : > { %v2639_v59 = vpop.eup %2638 }
 0x790   : > { %v1422_v60 = vadd.f32 1.0, %v2639_v59 }
 0x792   : > { %v1424_v11 = vmul.f32 %v1422_v60, %v1408_v62  ;;  %v1438_v62 = vadd.f32 %v2249_v39, %v2760_v8  ;;  %v2611_v8 = vld [vmem:[%s3081_s9 + $0x48] sm:$0xff]  }
 0x793   : > { %v2641_v61 = vpop.eup %2640 }
 0x794   : > { %v1423_v0 = vadd.f32 1.0, %v2641_v61 }
 0x796   : > { %v1425_v13 = vmul.f32 %v1423_v0, %v1409_v63 }
 0x798   : > { %v1426_v14 = vpack.c.bf16 %v1425_v13, %v1424_v11 }
 0x79a   : > { %2526 = vmatmul.mubr.msk.bf16.vlgmr.msra.gmra.mxu1 %vm457_vm0, %v1426_v14 }
 0x79b   : > { %2540 = vmatpush3.bf16.msra.mxu1 %v1604_v15  ;;  %2541 = vmatprep.mubr.msk.bf16.mxu1 %vm2651_vm1, %v2650_v33 }
 0x7a2   : > { %2542 = vmatmul.mubr.msk.bf16.vlgmr.msra.gmra.mxu1 %vm457_vm0, %v1426_v14 }
 0x7a3   : > { %2547 = vmatprep.mubr.msk.bf16.mxu1 %vm1174_vm4, %v2605_v10 }
 0x85a   : > { %v1480_v12 = vpop.f32.mrf.mxu1 }
 0x85c   : > { %v2527_v16 = vpop.f32.mrf.mxu1 }
 0x85e   : > { %v1483_v18 = vpop.f32.mrf.mxu1 }
 0x85f   : > { %v1495_v19 = vpack.c.bf16 %v1483_v18, %v1480_v12 }
 0x860   : > { %v2528_v20 = vpop.f32.mrf.mxu1 }
 0x861   : > { %2529 = vmatprep.subr.bf16.mxu0 %v1495_v19 }
 0x862   : > { %2530 = vmatpush3.bf16.msra.mxu0 %v1495_v19  ;;  %v1640_v23 = vpop.f32.mrf.mxu1 }
 0x863   : > { %2555 = vmatprep.subr.bf16.mxu0 %v2650_v33 }
 0x864   : > { %v2543_v26 = vpop.f32.mrf.mxu1 }
 0x865   : > { %2532 = vmatmul.mubr.msk.bf16.vlgmr.msra.gmra.mxu0 %vm1174_vm4, %v2603_v22  ;;  %v2612_v22 = vld [vmem:[%s3081_s9 + $0x50] sm:$0xff]  }
 0x866   : > { %v1643_v27 = vpop.f32.mrf.mxu1  ;;  %2535 = vmatprep.mubr.msk.bf16.mxu0 %vm1174_vm4, %v2604_v24  ;;  %2556 = vmatpush3.bf16.msra.mxu0 %v1765_v25 }
 0x867   : > { %v1656_v28 = vpack.c.bf16 %v1643_v27, %v1640_v23  ;;  %v2614_v27 = vld [vmem:[%s3081_s9 + $0x58] sm:$0xff]  }
 0x868   : > { %v2544_v29 = vpop.f32.mrf.mxu1 }
 0x869   : > { %2545 = vmatprep.subr.bf16.mxu1 %v1656_v28  ;;  %v2616_v29 = vld [vmem:[%s3081_s9 + $0x70] sm:$0xff]  }
 0x86a   : > { %2546 = vmatpush3.bf16.msra.mxu1 %v1656_v28  ;;  %v2615_v28 = vld [vmem:[%s3081_s9 + $0x68] sm:$0xff]  }
 0x86b   : > { %2571 = vmatprep.subr.bf16.mxu1 %v2650_v33 }
 0x86d   : > { %2536 = vmatmul.mubr.msk.bf16.gmra.mxu0 %vm1174_vm4, %v2606_v31  ;;  %2548 = vmatmul.mubr.msk.bf16.vlgmr.msra.gmra.mxu1 %vm1174_vm4, %v2607_v32 }
 0x86e   : > { %2572 = vmatpush3.bf16.msra.mxu1 %v1926_v35  ;;  %2551 = vmatprep.mubr.msk.bf16.mxu1 %vm1174_vm4, %v2608_v34 }
 0x86f   : > { %2557 = vmatprep.mubr.msk.bf16.mxu0 %vm2651_vm1, %v2650_v33 }
 0x875   : > { %2552 = vmatmul.mubr.msk.bf16.gmra.mxu1 %vm1174_vm4, %v2609_v36  ;;  %2558 = vmatmul.mubr.msk.bf16.vlgmr.msra.gmra.mxu0 %vm457_vm0, %v1426_v14 }
 0x876   : > { %2573 = vmatprep.mubr.msk.bf16.mxu1 %vm2651_vm1, %v2650_v33  ;;  %2563 = vmatprep.mubr.msk.bf16.mxu0 %vm1174_vm4, %v2610_v37  ;;  %v1433_v33 = vadd.f32 %v2249_v39, %v2740_v3 }
 0x87d   : > { %2574 = vmatmul.mubr.msk.bf16.vlgmr.msra.gmra.mxu1 %vm457_vm0, %v1426_v14 }
 0x87e   : > { %2579 = vmatprep.mubr.msk.bf16.mxu1 %vm1174_vm4, %v2613_v38 }
 0x925   : > { %v2533_v40 = vpop.f32.mrf.mxu0 }
 0x926   : > { %v1595_v43 = vadd.f32 %v2533_v40, %v1433_v33 }
 0x927   : > { %v1562_v41 = vpop.f32.mrf.mxu0 }
 0x928   : > { %v1593_v49 = vadd.f32 %v1562_v41, %v1431_v44 }
 0x929   : > { %v2534_v42 = vpop.f32.mrf.mxu0 }
 0x92a   : > { %v1596_v55 = vadd.f32 %v2534_v42, %v1434_v46 }
 0x92b   : > { %v1565_v45 = vpop.f32.mrf.mxu0 }
 0x92c   : > { %v1594_v56 = vadd.f32 %v1565_v45, %v1432_v50 }
 0x92d   : > { %v2537_v47 = vpop.f32.mrf.mxu0  ;;  %v2549_v48 = vpop.f32.mrf.mxu1 }
 0x92e   : > { %v1756_v52 = vadd.f32 %v2549_v48, %v1595_v43  ;;  %v1599_v59 = vadd.f32 %v2537_v47, %v1437_v51 }
 0x92f   : > { %v1578_v53 = vpop.f32.mrf.mxu0  ;;  %v1723_v54 = vpop.f32.mrf.mxu1 }
 0x930   : > { %v1754_v3 = vadd.f32 %v1723_v54, %v1593_v49  ;;  %v1597_v7 = vadd.f32 %v1578_v53, %v1435_v1 }
 0x931   : > { %v2538_v57 = vpop.f32.mrf.mxu0  ;;  %v2550_v58 = vpop.f32.mrf.mxu1 }
 0x932   : > { %v1757_v60 = vadd.f32 %v2550_v58, %v1596_v55  ;;  %v1600_v15 = vadd.f32 %v2538_v57, %v1438_v62 }
 0x933   : > { %v1581_v4 = vpop.f32.mrf.mxu0  ;;  %v1726_v61 = vpop.f32.mrf.mxu1 }
 0x934   : > { %v1755_v63 = vadd.f32 %v1726_v61, %v1594_v56  ;;  %v1598_v16 = vadd.f32 %v1581_v4, %v1436_v9 }
 0x935   : > { %v2553_v2 = vpop.f32.mrf.mxu1  ;;  %v1801_v0 = vpop.f32.mrf.mxu0 }
 0x936   : > { %v1760_v11 = vadd.f32 %v2553_v2, %v1599_v59 }
 0x937   : > { %v1739_v13 = vpop.f32.mrf.mxu1  ;;  %v2559_v14 = vpop.f32.mrf.mxu0 }
 0x938   : > { %v1758_v17 = vadd.f32 %v1739_v13, %v1597_v7 }
 0x939   : > { %v2554_v10 = vpop.f32.mrf.mxu1  ;;  %v1804_v12 = vpop.f32.mrf.mxu0 }
 0x93a   : > { %v1761_v5 = vadd.f32 %v2554_v10, %v1600_v15  ;;  %v1817_v18 = vpack.c.bf16 %v1804_v12, %v1801_v0 }
 0x93b   : > { %v1742_v19 = vpop.f32.mrf.mxu1  ;;  %v2560_v20 = vpop.f32.mrf.mxu0 }
 0x93c   : > { %v1759_v21 = vadd.f32 %v1742_v19, %v1598_v16  ;;  %2561 = vmatprep.subr.bf16.mxu0 %v1817_v18 }
 0x93d   : > { %2562 = vmatpush3.bf16.msra.mxu0 %v1817_v18  ;;  %v1962_v6 = vpop.f32.mrf.mxu1 }
 0x93f   : > { %v2575_v23 = vpop.f32.mrf.mxu1 }
 0x940   : > { %2564 = vmatmul.mubr.msk.bf16.vlgmr.msra.gmra.mxu0 %vm1174_vm4, %v2611_v8 }
 0x941   : > { %v1965_v24 = vpop.f32.mrf.mxu1  ;;  %2567 = vmatprep.mubr.msk.bf16.mxu0 %vm1174_vm4, %v2612_v22 }
 0x942   : > { %v1978_v25 = vpack.c.bf16 %v1965_v24, %v1962_v6 }
 0x943   : > { %v2576_v26 = vpop.f32.mrf.mxu1 }
 0x944   : > { %2577 = vmatprep.subr.bf16.mxu1 %v1978_v25 }
 0x945   : > { %2578 = vmatpush3.bf16.msra.mxu1 %v1978_v25 }
 0x948   : > { %2568 = vmatmul.mubr.msk.bf16.gmra.mxu0 %vm1174_vm4, %v2614_v27  ;;  %2580 = vmatmul.mubr.msk.bf16.vlgmr.msra.gmra.mxu1 %vm1174_vm4, %v2615_v28 }
 0x949   : > { %2583 = vmatprep.mubr.msk.bf16.mxu1 %vm1174_vm4, %v2616_v29 }
 0x950   : > { %2584 = vmatmul.mubr.msk.bf16.gmra.mxu1 %vm1174_vm4, %v2617_v30 }
 0xa00   : > { %v2565_v31 = vpop.f32.mrf.mxu0 }
 0xa01   : > { %v1917_v36 = vadd.f32 %v2565_v31, %v1756_v52 }
 0xa02   : > { %v1884_v32 = vpop.f32.mrf.mxu0 }
 0xa03   : > { %v1915_v39 = vadd.f32 %v1884_v32, %v1754_v3 }
 0xa04   : > { %v2566_v34 = vpop.f32.mrf.mxu0 }
 0xa05   : > { %v1918_v42 = vadd.f32 %v2566_v34, %v1757_v60 }
 0xa06   : > { %v1887_v35 = vpop.f32.mrf.mxu0 }
 0xa07   : > { %v1916_v45 = vadd.f32 %v1887_v35, %v1755_v63 }
 0xa08   : > { %v2569_v37 = vpop.f32.mrf.mxu0  ;;  %v2581_v38 = vpop.f32.mrf.mxu1 }
 0xa09   : > { %v2078_v40 = vadd.f32 %v2581_v38, %v1917_v36  ;;  %v1921_v49 = vadd.f32 %v2569_v37, %v1760_v11 }
 0xa0a   : > { %v1900_v33 = vpop.f32.mrf.mxu0  ;;  %v2045_v41 = vpop.f32.mrf.mxu1 }
 0xa0b   : > { %2086 = vst.msk [vmem:[%s3051_s15 + $0x10] sm:$0xff] %vm457_vm0, %v2078_v40  ;;  %v2076_v43 = vadd.f32 %v2045_v41, %v1915_v39  ;;  %v1919_v52 = vadd.f32 %v1900_v33, %v1758_v17 }
 0xa0c   : > { %v2582_v44 = vpop.f32.mrf.mxu1  ;;  %v2570_v47 = vpop.f32.mrf.mxu0 }
 0xa0d   : > { %2084 = vst.msk [vmem:[%s3051_s15] sm:$0xff] %vm457_vm0, %v2076_v43  ;;  %v2079_v46 = vadd.f32 %v2582_v44, %v1918_v42  ;;  %v1922_v3 = vadd.f32 %v2570_v47, %v1761_v5 }
 0xa0e   : > { %v2048_v48 = vpop.f32.mrf.mxu1  ;;  %v1903_v54 = vpop.f32.mrf.mxu0 }
 0xa0f   : > { %2087 = vst.msk [vmem:[%s3051_s15 + $0x18] sm:$0xff] %vm457_vm0, %v2079_v46  ;;  %v2077_v50 = vadd.f32 %v2048_v48, %v1916_v45  ;;  %v1920_v56 = vadd.f32 %v1903_v54, %v1759_v21 }
 0xa10   : > { %v2585_v51 = vpop.f32.mrf.mxu1 }
 0xa11   : > { %2085 = vst.msk [vmem:[%s3051_s15 + $0x8] sm:$0xff] %vm457_vm0, %v2077_v50  ;;  %v2082_v53 = vadd.f32 %v2585_v51, %v1921_v49 }
 0xa12   : > { %v2061_v55 = vpop.f32.mrf.mxu1 }
 0xa13   : > { %2090 = vst.msk [vmem:[%s3051_s15 + $0x30] sm:$0xff] %vm457_vm0, %v2082_v53  ;;  %v2080_v57 = vadd.f32 %v2061_v55, %v1919_v52 }
 0xa14   : > { %v2586_v58 = vpop.f32.mrf.mxu1 }
 0xa15   : > { %2088 = vst.msk [vmem:[%s3051_s15 + $0x20] sm:$0xff] %vm457_vm0, %v2080_v57  ;;  %v2083_v59 = vadd.f32 %v2586_v58, %v1922_v3 }
 0xa16   : > { %v2064_v1 = vpop.f32.mrf.mxu1 }
 0xa17   : > { %2091 = vst.msk [vmem:[%s3051_s15 + $0x38] sm:$0xff] %vm457_vm0, %v2083_v59  ;;  %v2081_v60 = vadd.f32 %v2064_v1, %v1920_v56 }
 0xa19   : > { %2089 = vst.msk [vmem:[%s3051_s15 + $0x28] sm:$0xff] %vm457_vm0, %v2081_v60 }
 0xa1a PF: > { %s23_s21 = sadd.s32 1, %s2648_s21  }
 0xa1b   : > { %p20_p4 = scmp.ge.s32.totalorder %s23_s21, 4  }
 0xa1d   :  { %22 = sbr.rel (!%p20_p4) target bundleno = 1 (0x1), region = 121 }

</bundles_post_ra>
